<compile_context>
chip_gen: v5e
topology: v5e:2x2
jax: 0.10.0
libtpu: 0.0.40
codegen_flags: <defaults>
</compile_context>

<pallas_src>
import jax
import jax.numpy as jnp
import numpy as np
from jax.experimental import pallas as pl
from jax.experimental.pallas import tpu as pltpu


def _round_up(x, m):
    return ((x + m - 1) // m) * m


def _cdiv(a, b):
    return -(-a // b)


def _scale_mask_kernel(x_ref, m_ref, o_ref):
    # One broadcast multiply per tile. m_ref is (tm, 1) f32 and broadcasts
    # across the lane-dense feature tile; multiply in f32 (exact 1/keep_prob,
    # matching torch's float scaling) then cast back to the output dtype.
    o_ref[...] = (x_ref[...].astype(jnp.float32) * m_ref[...]).astype(o_ref.dtype)


def snn_dropout(x, p=0.5, training=True, key=None, *, inplace=False,
                row_tile=512, block_bytes=4 * 1024 * 1024):
    """Pallas equivalent of SNNDropout.forward (F.dropout3d). x is NCDHW."""
    if (not training) or p == 0.0:
        return x
    if p >= 1.0:
        # F.dropout3d with p=1 zeroes everything (avoid 1/keep_prob blowup).
        return jnp.zeros_like(x)

    n, c, d, h, w = x.shape
    nc, f = n * c, d * h * w
    keep_prob = 1.0 - p
    if key is None:
        # NOTE: deterministic default (fine for tests). Training loops should
        # pass a fresh key each call, unlike torch's stateful RNG.
        key = jax.random.PRNGKey(0)

    # Per-(n, c) keep decision, pre-scaled by 1/keep_prob. Only nc elements,
    # kept in f32 so the scale is not quantized for bf16 inputs.
    keep = jax.random.bernoulli(key, keep_prob, (nc, 1))
    mask = keep.astype(jnp.float32) * jnp.float32(1.0 / keep_prob)

    # Free reshape (contiguous): one row per channel, spatial dims on lanes.
    x2d = x.reshape(nc, f)

    itemsize = jnp.dtype(x.dtype).itemsize

    # --- tile sizing (in bytes) ---
    # Row tile: sublane-aligned, no larger than needed.
    tm = min(row_tile, _round_up(nc, 8))
    # Feature tile: lane-aligned, sized so one block is ~block_bytes.
    tn = max(128, (block_bytes // (tm * itemsize)) // 128 * 128)
    tn = min(tn, _round_up(f, 128))

    # v7x: if the row axis has only one block, keep >=2 (ideally >=4) feature
    # blocks so the grid can be split across the two TensorCores.
    if _cdiv(nc, tm) < 2:
        for want in (4, 2):
            cap = (f // want) // 128 * 128
            if cap >= 128:
                tn = min(tn, cap)
                break

    grid = (_cdiv(nc, tm), _cdiv(f, tn))  # row outer, feature inner (intentional)

    # Pipelined VMEM: double-buffered x block + double-buffered out block
    # + mask (tiny). Set the scoped limit explicitly (v5e default is 16 MiB),
    # with headroom, capped well under v7x's 64 MiB physical VMEM.
    block_b = tm * tn * itemsize
    vmem_need = 4 * block_b + 2 * tm * 4 + (2 << 20)
    vmem_limit = int(min(max(vmem_need, 16 << 20), 48 << 20))

    out2d = pl.pallas_call(
        _scale_mask_kernel,
        out_shape=jax.ShapeDtypeStruct((nc, f), x.dtype),
        grid=grid,
        in_specs=[
            pl.BlockSpec((tm, tn), lambda i, j: (i, j)),
            # Mask block index is constant across the inner (feature) loop:
            # Pallas keeps it resident instead of re-DMAing every step.
            pl.BlockSpec((tm, 1), lambda i, j: (i, 0)),
        ],
        out_specs=pl.BlockSpec((tm, tn), lambda i, j: (i, j)),
        compiler_params=pltpu.CompilerParams(
            dimension_semantics=("parallel", "parallel"),
            vmem_limit_bytes=vmem_limit,
        ),
        input_output_aliases=({0: 0} if inplace else {}),
    )(x2d, mask)

    return out2d.reshape(n, c, d, h, w)


if __name__ == "__main__":
    key = jax.random.PRNGKey(0)
    kx, kmask = jax.random.split(key)

    # small NCDHW input: N=2, C=4, D=4, H=8, W=16
    x = jax.random.normal(kx, (2, 4, 4, 8, 16), dtype=jnp.float32)
    p = 0.5
    scale = 1.0 / (1.0 - p)

    y = jax.block_until_ready(snn_dropout(x, p=p, training=True, key=kmask))

    # sanity: every (n, c) channel is either fully dropped or scaled by 1/(1-p)
    x2d = np.asarray(x).reshape(8, -1)
    y2d = np.asarray(y).reshape(8, -1)
    for r in range(y2d.shape[0]):
        dropped = np.allclose(y2d[r], 0.0)
        kept = np.allclose(y2d[r], x2d[r] * scale, rtol=1e-5, atol=1e-5)
        assert dropped or kept, f"row {r} is neither dropped nor scaled-kept"

    # eval mode is identity
    y_eval = jax.block_until_ready(snn_dropout(x, p=p, training=False))
    assert np.allclose(np.asarray(y_eval), np.asarray(x))

    # p = 1.0 -> all zeros
    y_one = jax.block_until_ready(snn_dropout(x, p=1.0, training=True, key=kmask))
    assert np.allclose(np.asarray(y_one), 0.0)

    # non-tile-divisible spatial size exercises the ragged boundary blocks
    # (no wrapper-side padding anymore).
    x_odd = jax.random.normal(kx, (2, 4, 3, 5, 7), dtype=jnp.float32)
    y_odd = jax.block_until_ready(snn_dropout(x_odd, p=p, training=True, key=kmask))
    xo = np.asarray(x_odd).reshape(8, -1)
    yo = np.asarray(y_odd).reshape(8, -1)
    for r in range(yo.shape[0]):
        dropped = np.allclose(yo[r], 0.0)
        kept = np.allclose(yo[r], xo[r] * scale, rtol=1e-5, atol=1e-5)
        assert dropped or kept, f"odd-shape row {r} is neither dropped nor scaled-kept"

    # bf16 input: scale applied in f32 inside the kernel, product cast to bf16
    x_bf = x.astype(jnp.bfloat16)
    y_bf = jax.block_until_ready(snn_dropout(x_bf, p=p, training=True, key=kmask))
    xb = np.asarray(x_bf.astype(jnp.float32)).reshape(8, -1)
    yb = np.asarray(y_bf.astype(jnp.float32)).reshape(8, -1)
    for r in range(yb.shape[0]):
        dropped = np.allclose(yb[r], 0.0)
        kept = np.allclose(yb[r], xb[r] * scale, rtol=1e-2, atol=1e-2)
        assert dropped or kept, f"bf16 row {r} is neither dropped nor scaled-kept"

    print("KERNEL_OK")
</pallas_src>

<mosaic_0001>
module attributes {stable_mosaic.version = 11 : i64} {
  func.func @_scale_mask_kernel(%arg0: i32, %arg1: i32, %arg2: memref<8x128xf32, #tpu.memory_space<vmem>>, %arg3: memref<8x1xf32, #tpu.memory_space<vmem>>, %arg4: memref<8x128xf32, #tpu.memory_space<vmem>>) attributes {dimension_semantics = [#tpu.dimension_semantics<parallel>, #tpu.dimension_semantics<parallel>], iteration_bounds = array<i64: 1, 4>, scalar_prefetch = 0 : i64, scratch_operands = 0 : i64, tpu.core_type = #tpu.core_type<tc>, window_params = [{transform_indices = @transform_0, window_bounds = array<i64: 8, 128>}, {transform_indices = @transform_1, window_bounds = array<i64: 8, 1>}, {transform_indices = @transform_2, window_bounds = array<i64: 8, 128>}]} {
    %c0 = arith.constant 0 : index
    %c0_0 = arith.constant 0 : index
    %0 = vector.load %arg2[%c0, %c0_0] : memref<8x128xf32, #tpu.memory_space<vmem>>, vector<8x128xf32>
    %c0_1 = arith.constant 0 : index
    %c0_2 = arith.constant 0 : index
    %1 = vector.load %arg3[%c0_1, %c0_2] : memref<8x1xf32, #tpu.memory_space<vmem>>, vector<8x1xf32>
    %2 = vector.broadcast %1 : vector<8x1xf32> to vector<8x128xf32>
    %3 = arith.mulf %0, %2 : vector<8x128xf32>
    %c0_3 = arith.constant 0 : index
    %c0_4 = arith.constant 0 : index
    %4 = vector.load %arg4[%c0_3, %c0_4] : memref<8x128xf32, #tpu.memory_space<vmem>>, vector<8x128xf32>
    tpu.vector_store %arg4[%c0_3, %c0_4], %3 {strides = array<i32>} : memref<8x128xf32, #tpu.memory_space<vmem>>, vector<8x128xf32>,
    return
  }
  func.func @transform_0(%arg0: i32, %arg1: i32) -> (i32, i32) {
    %c0_i32 = arith.constant 0 : i32
    return %arg0, %arg1 : i32, i32
  }
  func.func @transform_1(%arg0: i32, %arg1: i32) -> (i32, i32) {
    %c0_i32 = arith.constant 0 : i32
    %c0_i32_0 = arith.constant 0 : i32
    return %arg0, %c0_i32 : i32, i32
  }
  func.func @transform_2(%arg0: i32, %arg1: i32) -> (i32, i32) {
    %c0_i32 = arith.constant 0 : i32
    return %arg0, %arg1 : i32, i32
  }
}

</mosaic_0001>

<bundles_post_ra>
// kernel: tpu_custom_call.1
= control target key start
LH: loop header
LB: loop body
LE: loop exit
PB: predicated region body
PF: predicated region fallthrough
CT: control target
= control target key end

     0   :  { %7 = vsyncpa [#allocation3], 0  ;;  %s649_s0 = inlined_call_operand.hbm [shape: f32[8,512], index: 0, kind: input, shape index: {}]   ;;  %s650_s1 = inlined_call_operand.vmem [shape: f32[8,1], index: 1, kind: input, shape index: {}]   ;;  %s651_s2 = inlined_call_operand.hbm [shape: f32[8,512], index: 2, kind: output, shape index: {}]  }
   0x1   :  { %9 = vsyncpa [#allocation3 + $0x1], 0 }
   0x2   :  { %10 = vsyncpa [#allocation4], 0 }
   0x3   :  { %12 = vsyncpa [#allocation4 + $0x1], 0  ;;  %s528_s9 = smov 0   ;;  %s530_s10 = smov 0  }
   0x4   :  { %s532_s11 = smov 0   ;;  %s534_s12 = smov 0  }
   0x5   :  { %s536_s13 = smov 0   ;;  %s538_s14 = smov 0  }
   0x6 LB: > { %s320_s15 = sadd.s32 4294967295, %s510_s14   ;;  %s321_s16 = sadd.s32 4294967294, %s510_s14   ;;  %s510_s14 = sphi %s538_s14, %s18_s14   ;;  %s506_s13 = sphi %s536_s13, %s660_s13   ;;  %s502_s12 = sphi %s534_s12, %s659_s12   ;;  %s498_s11 = sphi %s532_s11, %s658_s11   ;;  %s494_s10 = sphi %s530_s10, %s657_s10   ;;  %s490_s9 = sphi %s528_s9, %s656_s9  }
   0x7   : > { %s27_s17 = sadd.s32 1, %s506_s13  ;;  %s39_s18 = sadd.s32 1, %s498_s11 }
   0x8   : > { %p28_p0 = scmp.ge.s32.totalorder %s27_s17, 4  ;;  %p46_p1 = scmp.ne.s32.totalorder %s498_s11, %s494_s10 }
   0x9   : > { %p47_p2 = scmp.eq.s32.totalorder %s510_s14, 0  ;;  %p52_p3 = scmp.ne.s32.totalorder %s494_s10, %s490_s9 }
   0xa   : > { %s662_s17 = smov (%p28_p0, %s27_s17), 0  ;;  %p53_p5 = scmp.eq.s32.totalorder %s320_s15, 0 }
   0xb   : > { %p569_p4 = por %p47_p2, %p46_p1  ;;  %s35_s20 = ssub.s32 %s506_s13, %s662_s17 }
   0xc   : > { %p104_p6 = scmp.eq.s32.totalorder %s320_s15, 3  ;;  %p37_p7 = scmp.eq.s32.totalorder %s35_s20, 0 }
   0xd   : > { %p575_p8 = por %p53_p5, %p52_p3  ;;  %p110_p10 = scmp.eq.s32.totalorder %s321_s16, 3 }
   0xe   : > { %p579_p9 = por %p104_p6, %p46_p1  ;;  %p346_p12 = scmp.lt.s32.totalorder %s510_s14, 4 }
   0xf   : > { %s584_s23 = scalar_select %p37_p7, %s498_s11, %s39_s18  }
  0x10   : > { %p586_p11 = por %p110_p10, %p52_p3  ;;  %s137_s25 = sand.u32 1, %s498_s11  }
  0x11   : > { %s325_s26 = sshll.u32 %s137_s25, 3  ;;  %s326_s27 = sshll.u32 %s506_s13, 3 }
  0x12   : > { %s147_s30 = scalar_lea.hbm %s649_s0, %s326_s27  ;;  %s141_s3 = scalar_lea.vmem [#allocation2], %s325_s26 }
  0x13   : > { %s151_s4 = sshll.u32 %s141_s3, 4  ;;  %s149_s5 = sshll.u32 %s147_s30, 4  ;;  %s152_s4 = int_to_ptr.vmem [resolvable:$true] %s151_s4  ;;  %s150_s5 = int_to_ptr.hbm [resolvable:$true] %s149_s5 }
  0x14   : > { %p339_p13 = pnand %p346_p12, %p569_p4  ;;  %p327_p0 = scmp.ge.s32.totalorder %s510_s14, 1 }
  0x15   : > { %p156_p1 = scmp.lt.s32.totalorder %s510_s14, 5  ;;  %s138_s6 = scalar_lea.sflag [#allocation3], %s137_s25 }
  0x16   : > { %341 = dma.hbm_to_vmem [thread:$0]  (!%p339_p13), %s150_s5, 128, %s152_s4, %s138_s6  }
  0x17   : > { %p157_p2 = pnand %p327_p0, %p156_p1 }
  0x18   : > { %s601_s7 = sand.u32 (!%p157_p2), 1, %s494_s10  }
  0x19   : > { %160 = sbr.rel (%p157_p2) target bundleno = 153 (0x99), region = 28  ;;  %s328_s8 = sshll.u32 (!%p157_p2), %s601_s7, 3 }
  0x1a   : > { %s163_s15 = scalar_lea.sflag (!%p157_p2), [#allocation3], %s601_s7  ;;  %s166_s16 = scalar_lea.vmem (!%p157_p2), [#allocation2], %s328_s8 }
  0x1e   : > { %481 = dma.done.wait (%p575_p8), %s163_s15, 128  }
  0x1f   : > { %483 = vsyncadd (%p575_p8), %s163_s15, 4294967168  ;;  %v512_v0 = vmov 0   ;;  %v197_v1 = vld [vmem:[%s650_s1] sm:$0xff]  ;;  %s331_s20 = sshll.u32 %s502_s12, 3  ;;  %s191_s28 = scalar_lea.vmem [#allocation5], %s328_s8 }
  0x20   : > { %397 = vset.pattern.permute.xlu0 %v512_v0  ;;  %s218_s27 = scalar_lea.hbm %s651_s2, %s331_s20  ;;  %v196_v2 = vld [vmem:[%s166_s16] sm:$0xff]  ;;  %s220_s29 = sshll.u32 %s191_s28, 4  ;;  %s221_s29 = int_to_ptr.vmem [resolvable:$true] %s220_s29 }
  0x21   : > { %200 = vperm.xlu0 %397, %v197_v1   ;;  %s222_s21 = sshll.u32 %s218_s27, 4  ;;  %s206_s30 = scalar_lea.sflag [#allocation4], %s601_s7  ;;  %s223_s21 = int_to_ptr.hbm [resolvable:$true] %s222_s21 }
  0x22   : > { %s442_s3 = sshra.s32 %s223_s21, 4  ;;  %s448_s6 = scalar_lea.hbm %s651_s2, 32  ;;  %s443_s3 = int_to_ptr.hbm [resolvable:$true] %s442_s3 }
  0x23   : > { %s444_s4 = scalar_lea.hbm %s443_s3, 8  ;;  %p449_p6 = scmp.lt.s32.totalorder %s443_s3, %s651_s2 }
  0x24   : > { %p445_p3 = scmp.ne.s32.totalorder %s443_s3, %s444_s4  ;;  %p450_p7 = scmp.lt.s32.totalorder %s448_s6, %s444_s4 }
  0x26   : > { %p446_p4 = pnand %p445_p3, %p579_p9  ;;  %p451_p8 = por %p450_p7, %p449_p6 }
  0x28   : > { %p447_p5 = pneg %p446_p4 }
  0x2a   : > { %p452_p10 = pnand %p451_p8, %p447_p5 }
  0x93   : > { %v201_v3 = vpop.permute.xlu0 %200 }
  0x94   : > { %v203_v4 = vmul.f32 %v201_v3, %v196_v2 }
  0x96   : > { %204 = vst [vmem:[%s191_s28] sm:$0xff] %v203_v4 }
  0x97   : > { %455 = shalt.err (!%p452_p10)
}
  0x98   : > { %336 = dma.vmem_to_hbm [thread:$0]  (%p579_p9), %s221_s29, 128, %s223_s21, %s206_s30  }
  0x99 PF: > { %p347_p12 = scmp.ge.s32.totalorder %s510_s14, 2  ;;  %s234_s7 = sand.u32 1, %s490_s9  }
  0x9a   : > { %s235_s16 = scalar_lea.sflag [#allocation4], %s234_s7 }
  0x9b   : > { %p343_p13 = pnand %p347_p12, %p586_p11 }
  0x9d   : > { %p344_p0 = pneg %p343_p13 }
  0x9f   : > { %485 = dma.done.wait (%p344_p0), %s235_s16, 128  }
  0xa0   : > { %487 = vsyncadd (%p344_p0), %s235_s16, 4294967168  ;;  %s18_s14 = sadd.s32 1, %s510_s14   ;;  %s656_s9 = smov %s494_s10 }
  0xa1   : > { %p15_p1 = scmp.ge.s32.totalorder %s18_s14, 6   ;;  %s657_s10 = smov %s498_s11 }
  0xa2   : > { %s658_s11 = smov %s584_s23  ;;  %s659_s12 = smov %s506_s13 }
  0xa3   : > { %s660_s13 = smov %s662_s17  ;;  %17 = sbr.rel (!%p15_p1) target bundleno = 6 (0x6), region = 76 }
  0xa8   :  { %241 = vsyncpa [#allocation3], 1 }
  0xa9   :  { %243 = vsyncpa [#allocation3 + $0x1], 1 }
  0xaa   :  { %244 = vsyncpa [#allocation4], 1 }
  0xab   :  { %246 = vsyncpa [#allocation4 + $0x1], 1 }

</bundles_post_ra>
